<compile_context>
chip_gen: v6e
topology: v6e:2x2x1
jax: 0.10.0
libtpu: 0.0.40
codegen_flags: <defaults>
</compile_context>

<pallas_src>
import functools

import jax
import jax.numpy as jnp
from jax import lax
from jax.experimental import pallas as pl
from jax.experimental.pallas import tpu as pltpu


def _round_up(x: int, m: int) -> int:
    return (x + m - 1) // m * m


def _pick_lane_chunk(tile_b: int) -> int:
    # Largest multiple of 128 that divides tile_b and is <= 512, so the live
    # per-chunk hidden state ([N_HIDDEN, chunk] f32) stays inside the vreg file.
    for c in (512, 384, 256, 128):
        if tile_b % c == 0:
            return c
    return tile_b


def _fcn_kernel(n_linear, lane_chunk, n_chunks, vpu_first, bf16_tanh, *refs):
    """Fused MLP over one batch tile, processed in lane chunks.

    refs = (x_ref, w0_ref, b0_ref, w1_ref, b1_ref, ..., out_ref)
      x_ref   : [N_INPUT, TILE_B]   (batch in lanes)
      wK_ref  : [out_k, in_k]       (torch layout, resident)
      bK_ref  : [out_k, 1]          (resident)
      out_ref : [N_OUTPUT, TILE_B]
    """
    x_ref = refs[0]
    out_ref = refs[-1]
    params = refs[1:-1]

    # Weights/biases are tiny (<= 32x32 f32): load once per grid step and reuse
    # for every lane chunk (hoisted out of the chunk loop).
    ws = [params[2 * i][...] for i in range(n_linear)]
    bs = [params[2 * i + 1][...] for i in range(n_linear)]

    def chunk_body(c, carry):
        off = pl.multiple_of(c * lane_chunk, lane_chunk)
        h = x_ref[:, pl.ds(off, lane_chunk)].astype(jnp.float32)   # [in, chunk]
        for li in range(n_linear):
            w, b = ws[li], bs[li]
            if li == 0 and vpu_first:
                # K = N_INPUT is tiny: broadcast FMAs on the VPU instead of a
                # nearly-empty MXU push (K=2 uses <2% of the systolic array).
                acc = w[:, 0:1] * h[0:1, :]
                for k in range(1, w.shape[1]):
                    acc = acc + w[:, k:k + 1] * h[k:k + 1, :]
                h = acc + b
            else:
                h = jnp.dot(w, h, preferred_element_type=jnp.float32,
                            precision=jax.lax.Precision.HIGHEST) + b
            if li < n_linear - 1:                      # tanh on all but last layer
                if bf16_tanh:
                    # v6e/v7x: native bf16 EUP path ~2x tanh throughput.
                    h = jnp.tanh(h.astype(jnp.bfloat16)).astype(jnp.float32)
                else:
                    h = jnp.tanh(h)
        out_ref[:, pl.ds(off, lane_chunk)] = h.astype(out_ref.dtype)
        return carry

    lax.fori_loop(0, n_chunks, chunk_body, 0)


def fcn_forward_t(x_t, weights, biases, *, tile_b: int = 2048,
                  bf16_tanh: bool = False):
    """Fused FCN forward in transposed ("batch in lanes") layout.

    x_t:     [N_INPUT, batch]  float32   (no host-side transpose needed)
    weights: list of [out, in] float32   (torch nn.Linear layout)
    biases:  list of [out, 1]  float32
    returns  [N_OUTPUT, batch] float32
    """
    n_linear = len(weights)
    n_in, batch = x_t.shape
    n_out = weights[-1].shape[0]

    # Lane-friendly tile: multiple of 128, large (amortize per-step overhead),
    # but keep >= 2 grid steps when the batch permits (v7x dual-TC sharding).
    b_pad128 = _round_up(max(batch, 1), 128)
    tile_b = max(128, _round_up(tile_b, 128))
    tile_b = min(tile_b, b_pad128)
    if b_pad128 >= 256 and 2 * tile_b > b_pad128:
        tile_b = _round_up((b_pad128 + 1) // 2, 128)
    b_pad = _round_up(batch, tile_b)
    grid = (b_pad // tile_b,)
    lane_chunk = _pick_lane_chunk(tile_b)
    n_chunks = tile_b // lane_chunk

    if b_pad != batch:
        x_t = jnp.pad(x_t, ((0, 0), (0, b_pad - batch)))

    vpu_first = weights[0].shape[1] <= 8   # tiny-K first layer -> VPU FMAs

    args = [x_t]
    in_specs = [pl.BlockSpec((n_in, tile_b), lambda i: (0, i))]
    for w, b in zip(weights, biases):
        args.append(w)
        in_specs.append(pl.BlockSpec(w.shape, lambda i: (0, 0)))   # resident weight
        args.append(b)
        in_specs.append(pl.BlockSpec(b.shape, lambda i: (0, 0)))   # resident bias
    out_specs = pl.BlockSpec((n_out, tile_b), lambda i: (0, i))

    # Advisory cost estimate: MLP matmul flops + tanh transcendentals.
    flops = 2 * sum(w.shape[0] * w.shape[1] for w in weights) * b_pad
    transcendentals = sum(w.shape[0] for w in weights[:-1]) * b_pad
    bytes_accessed = 4 * (
        x_t.size + n_out * b_pad
        + sum(w.size for w in weights) + sum(b.size for b in biases)
    )

    out_t = pl.pallas_call(
        functools.partial(_fcn_kernel, n_linear, lane_chunk, n_chunks,
                          vpu_first, bf16_tanh),
        grid=grid,
        out_shape=jax.ShapeDtypeStruct((n_out, b_pad), jnp.float32),
        in_specs=in_specs,
        out_specs=out_specs,
        compiler_params=pltpu.CompilerParams(
            dimension_semantics=("parallel",),
        ),
        cost_estimate=pl.CostEstimate(
            flops=flops,
            transcendentals=transcendentals,
            bytes_accessed=bytes_accessed,
        ),
    )(*args)

    return out_t[:, :batch]                               # [n_out, batch]


def fcn_forward(x, weights, biases, *, tile_b: int = 2048,
                bf16_tanh: bool = False):
    """Torch-layout wrapper: x [batch, N_INPUT] -> [batch, N_OUTPUT].

    For very large batches, prefer producing x already in [N_INPUT, batch]
    layout and calling fcn_forward_t directly to avoid the host-side transpose.
    """
    out_t = fcn_forward_t(jnp.transpose(x), weights, biases,
                          tile_b=tile_b, bf16_tanh=bf16_tanh)
    return jnp.transpose(out_t)                            # [batch, n_out]


def init_fcn_params(key, n_input, n_output, n_hidden, n_layers):
    """Deterministic init matching the torch module's layer shapes.

    Weights in torch layout [out, in]; biases as [out, 1] (kernel-native).
    """
    dims = [n_input] + [n_hidden] * n_layers + [n_output]
    weights, biases = [], []
    for i in range(len(dims) - 1):
        fan_in, fan_out = dims[i], dims[i + 1]
        key, kw, kb = jax.random.split(key, 3)
        bound = 1.0 / jnp.sqrt(fan_in)   # torch.nn.Linear default: U(-1/sqrt(fan_in), ...)
        w = jax.random.uniform(kw, (fan_out, fan_in), jnp.float32, -bound, bound)
        b = jax.random.uniform(kb, (fan_out,), jnp.float32, -bound, bound)
        weights.append(w)
        biases.append(b.reshape(fan_out, 1))
    return weights, biases


def fcn_reference(x, weights, biases):
    """Plain-JAX reference mirroring the torch forward pass (f32 precision)."""
    h = x
    for i, (w, b) in enumerate(zip(weights, biases)):
        h = jnp.dot(h, w.T, precision=jax.lax.Precision.HIGHEST) + b.reshape(1, -1)
        if i < len(weights) - 1:
            h = jnp.tanh(h)
    return h


if __name__ == "__main__":
    # Small shapes consistent with a typical FCN / PINN use of this module.
    N_INPUT, N_OUTPUT, N_HIDDEN, N_LAYERS = 2, 1, 32, 3
    BATCH = 8

    key = jax.random.PRNGKey(0)
    key, kx = jax.random.split(key)
    x = jax.random.normal(kx, (BATCH, N_INPUT), jnp.float32)

    weights, biases = init_fcn_params(key, N_INPUT, N_OUTPUT, N_HIDDEN, N_LAYERS)

    out = jax.block_until_ready(fcn_forward(x, weights, biases))
    ref = fcn_reference(x, weights, biases)
    assert out.shape == (BATCH, N_OUTPUT), out.shape
    assert jnp.allclose(out, ref, atol=1e-5, rtol=1e-5), (
        f"max abs diff {jnp.max(jnp.abs(out - ref))}"
    )

    # Multi-tile batch: exercises the 2-step grid (dual-TC path) and the
    # in-kernel lane-chunk loop.
    key, kx2 = jax.random.split(key)
    x_big = jax.random.normal(kx2, (1300, N_INPUT), jnp.float32)
    out_big = jax.block_until_ready(fcn_forward(x_big, weights, biases))
    ref_big = fcn_reference(x_big, weights, biases)
    assert out_big.shape == (1300, N_OUTPUT), out_big.shape
    assert jnp.allclose(out_big, ref_big, atol=1e-5, rtol=1e-5), (
        f"max abs diff {jnp.max(jnp.abs(out_big - ref_big))}"
    )

    print("KERNEL_OK")
</pallas_src>

<mosaic_0001>
module attributes {stable_mosaic.version = 11 : i64} {
  func.func @_fcn_kernel(%arg0: i32, %arg1: memref<2x128xf32, #tpu.memory_space<vmem>>, %arg2: memref<32x2xf32, #tpu.memory_space<vmem>>, %arg3: memref<32x1xf32, #tpu.memory_space<vmem>>, %arg4: memref<32x32xf32, #tpu.memory_space<vmem>>, %arg5: memref<32x1xf32, #tpu.memory_space<vmem>>, %arg6: memref<32x32xf32, #tpu.memory_space<vmem>>, %arg7: memref<32x1xf32, #tpu.memory_space<vmem>>, %arg8: memref<1x32xf32, #tpu.memory_space<vmem>>, %arg9: memref<1x1xf32, #tpu.memory_space<vmem>>, %arg10: memref<1x128xf32, #tpu.memory_space<vmem>>) attributes {dimension_semantics = [#tpu.dimension_semantics<parallel>], iteration_bounds = array<i64: 1>, scalar_prefetch = 0 : i64, scratch_operands = 0 : i64, tpu.core_type = #tpu.core_type<tc>, window_params = [{transform_indices = @transform_0, window_bounds = array<i64: 2, 128>}, {pipeline_mode = #tpu.pipeline_mode<synchronous>, transform_indices = @transform_1, window_bounds = array<i64: 32, 2>}, {pipeline_mode = #tpu.pipeline_mode<synchronous>, transform_indices = @transform_2, window_bounds = array<i64: 32, 1>}, {pipeline_mode = #tpu.pipeline_mode<synchronous>, transform_indices = @transform_3, window_bounds = array<i64: 32, 32>}, {pipeline_mode = #tpu.pipeline_mode<synchronous>, transform_indices = @transform_4, window_bounds = array<i64: 32, 1>}, {pipeline_mode = #tpu.pipeline_mode<synchronous>, transform_indices = @transform_5, window_bounds = array<i64: 32, 32>}, {pipeline_mode = #tpu.pipeline_mode<synchronous>, transform_indices = @transform_6, window_bounds = array<i64: 32, 1>}, {pipeline_mode = #tpu.pipeline_mode<synchronous>, transform_indices = @transform_7, window_bounds = array<i64: 1, 32>}, {pipeline_mode = #tpu.pipeline_mode<synchronous>, transform_indices = @transform_8, window_bounds = array<i64: 1, 1>}, {transform_indices = @transform_9, window_bounds = array<i64: 1, 128>}]} {
    %c0 = arith.constant 0 : index
    %c0_0 = arith.constant 0 : index
    %0 = vector.load %arg2[%c0, %c0_0] : memref<32x2xf32, #tpu.memory_space<vmem>>, vector<32x2xf32>
    %c0_1 = arith.constant 0 : index
    %c0_2 = arith.constant 0 : index
    %1 = vector.load %arg4[%c0_1, %c0_2] : memref<32x32xf32, #tpu.memory_space<vmem>>, vector<32x32xf32>
    %c0_3 = arith.constant 0 : index
    %c0_4 = arith.constant 0 : index
    %2 = vector.load %arg6[%c0_3, %c0_4] : memref<32x32xf32, #tpu.memory_space<vmem>>, vector<32x32xf32>
    %c0_5 = arith.constant 0 : index
    %c0_6 = arith.constant 0 : index
    %3 = vector.load %arg8[%c0_5, %c0_6] : memref<1x32xf32, #tpu.memory_space<vmem>>, vector<1x32xf32>
    %c0_7 = arith.constant 0 : index
    %c0_8 = arith.constant 0 : index
    %4 = vector.load %arg3[%c0_7, %c0_8] : memref<32x1xf32, #tpu.memory_space<vmem>>, vector<32x1xf32>
    %c0_9 = arith.constant 0 : index
    %c0_10 = arith.constant 0 : index
    %5 = vector.load %arg5[%c0_9, %c0_10] : memref<32x1xf32, #tpu.memory_space<vmem>>, vector<32x1xf32>
    %c0_11 = arith.constant 0 : index
    %c0_12 = arith.constant 0 : index
    %6 = vector.load %arg7[%c0_11, %c0_12] : memref<32x1xf32, #tpu.memory_space<vmem>>, vector<32x1xf32>
    %c0_13 = arith.constant 0 : index
    %c0_14 = arith.constant 0 : index
    %7 = vector.load %arg9[%c0_13, %c0_14] : memref<1x1xf32, #tpu.memory_space<vmem>>, vector<1x1xf32>
    %c0_i32 = arith.constant 0 : i32
    %c128_i32 = arith.constant 128 : i32
    %8 = arith.muli %c0_i32, %c128_i32 : i32
    %9 = tpu.assume_multiple %8, 128 : i32
    %c0_15 = arith.constant 0 : index
    %10 = arith.index_cast %9 : i32 to index
    %11 = vector.load %arg1[%c0_15, %10] : memref<2x128xf32, #tpu.memory_space<vmem>>, vector<2x128xf32>
    %12 = vector.extract_strided_slice %0 {offsets = [0, 0], sizes = [32, 1], strides = [1, 1]} : vector<32x2xf32> to vector<32x1xf32>
    %13 = vector.extract_strided_slice %11 {offsets = [0, 0], sizes = [1, 128], strides = [1, 1]} : vector<2x128xf32> to vector<1x128xf32>
    %14 = vector.broadcast %12 : vector<32x1xf32> to vector<32x128xf32>
    %15 = vector.broadcast %13 : vector<1x128xf32> to vector<32x128xf32>
    %16 = arith.mulf %14, %15 : vector<32x128xf32>
    %17 = vector.extract_strided_slice %0 {offsets = [0, 1], sizes = [32, 1], strides = [1, 1]} : vector<32x2xf32> to vector<32x1xf32>
    %18 = vector.extract_strided_slice %11 {offsets = [1, 0], sizes = [1, 128], strides = [1, 1]} : vector<2x128xf32> to vector<1x128xf32>
    %19 = vector.broadcast %17 : vector<32x1xf32> to vector<32x128xf32>
    %20 = vector.broadcast %18 : vector<1x128xf32> to vector<32x128xf32>
    %21 = arith.mulf %19, %20 : vector<32x128xf32>
    %22 = arith.addf %16, %21 : vector<32x128xf32>
    %23 = vector.broadcast %4 : vector<32x1xf32> to vector<32x128xf32>
    %24 = arith.addf %22, %23 : vector<32x128xf32>
    %25 = math.tanh %24 : vector<32x128xf32>
    %cst = arith.constant dense<0.000000e+00> : vector<32x128xf32>
    %26 = tpu.matmul %1, %25, %cst {dimension_numbers = #tpu.dot_dimension_numbers<[1], [0], [0], [1], [0, 0, 1, 1], [], []>, precision = #tpu.contract_precision<fp32>} : vector<32x32xf32>, vector<32x128xf32>, vector<32x128xf32> -> vector<32x128xf32>
    %27 = vector.broadcast %5 : vector<32x1xf32> to vector<32x128xf32>
    %28 = arith.addf %26, %27 : vector<32x128xf32>
    %29 = math.tanh %28 : vector<32x128xf32>
    %cst_16 = arith.constant dense<0.000000e+00> : vector<32x128xf32>
    %30 = tpu.matmul %2, %29, %cst_16 {dimension_numbers = #tpu.dot_dimension_numbers<[1], [0], [0], [1], [0, 0, 1, 1], [], []>, precision = #tpu.contract_precision<fp32>} : vector<32x32xf32>, vector<32x128xf32>, vector<32x128xf32> -> vector<32x128xf32>
    %31 = vector.broadcast %6 : vector<32x1xf32> to vector<32x128xf32>
    %32 = arith.addf %30, %31 : vector<32x128xf32>
    %33 = math.tanh %32 : vector<32x128xf32>
    %cst_17 = arith.constant dense<0.000000e+00> : vector<1x128xf32>
    %34 = tpu.matmul %3, %33, %cst_17 {dimension_numbers = #tpu.dot_dimension_numbers<[1], [0], [0], [1], [0, 0, 1, 1], [], []>, precision = #tpu.contract_precision<fp32>} : vector<1x32xf32>, vector<32x128xf32>, vector<1x128xf32> -> vector<1x128xf32>
    %35 = vector.broadcast %7 : vector<1x1xf32> to vector<1x128xf32>
    %36 = arith.addf %34, %35 : vector<1x128xf32>
    %c0_18 = arith.constant 0 : index
    %37 = arith.index_cast %9 : i32 to index
    %38 = vector.load %arg10[%c0_18, %37] : memref<1x128xf32, #tpu.memory_space<vmem>>, vector<1x128xf32>
    tpu.vector_store %arg10[%c0_18, %37], %36 {strides = array<i32>} : memref<1x128xf32, #tpu.memory_space<vmem>>, vector<1x128xf32>,
    %c1_i32 = arith.constant 1 : i32
    return
  }
  func.func @transform_0(%arg0: i32) -> (i32, i32) {
    %c0_i32 = arith.constant 0 : i32
    %c0_i32_0 = arith.constant 0 : i32
    return %c0_i32, %arg0 : i32, i32
  }
  func.func @transform_1(%arg0: i32) -> (i32, i32) {
    %c0_i32 = arith.constant 0 : i32
    %c0_i32_0 = arith.constant 0 : i32
    %c0_i32_1 = arith.constant 0 : i32
    return %c0_i32, %c0_i32_0 : i32, i32
  }
  func.func @transform_2(%arg0: i32) -> (i32, i32) {
    %c0_i32 = arith.constant 0 : i32
    %c0_i32_0 = arith.constant 0 : i32
    %c0_i32_1 = arith.constant 0 : i32
    return %c0_i32, %c0_i32_0 : i32, i32
  }
  func.func @transform_3(%arg0: i32) -> (i32, i32) {
    %c0_i32 = arith.constant 0 : i32
    %c0_i32_0 = arith.constant 0 : i32
    %c0_i32_1 = arith.constant 0 : i32
    return %c0_i32, %c0_i32_0 : i32, i32
  }
  func.func @transform_4(%arg0: i32) -> (i32, i32) {
    %c0_i32 = arith.constant 0 : i32
    %c0_i32_0 = arith.constant 0 : i32
    %c0_i32_1 = arith.constant 0 : i32
    return %c0_i32, %c0_i32_0 : i32, i32
  }
  func.func @transform_5(%arg0: i32) -> (i32, i32) {
    %c0_i32 = arith.constant 0 : i32
    %c0_i32_0 = arith.constant 0 : i32
    %c0_i32_1 = arith.constant 0 : i32
    return %c0_i32, %c0_i32_0 : i32, i32
  }
  func.func @transform_6(%arg0: i32) -> (i32, i32) {
    %c0_i32 = arith.constant 0 : i32
    %c0_i32_0 = arith.constant 0 : i32
    %c0_i32_1 = arith.constant 0 : i32
    return %c0_i32, %c0_i32_0 : i32, i32
  }
  func.func @transform_7(%arg0: i32) -> (i32, i32) {
    %c0_i32 = arith.constant 0 : i32
    %c0_i32_0 = arith.constant 0 : i32
    %c0_i32_1 = arith.constant 0 : i32
    return %c0_i32, %c0_i32_0 : i32, i32
  }
  func.func @transform_8(%arg0: i32) -> (i32, i32) {
    %c0_i32 = arith.constant 0 : i32
    %c0_i32_0 = arith.constant 0 : i32
    %c0_i32_1 = arith.constant 0 : i32
    return %c0_i32, %c0_i32_0 : i32, i32
  }
  func.func @transform_9(%arg0: i32) -> (i32, i32) {
    %c0_i32 = arith.constant 0 : i32
    %c0_i32_0 = arith.constant 0 : i32
    return %c0_i32, %arg0 : i32, i32
  }
}

</mosaic_0001>

<bundles_post_ra>
// kernel: tpu_custom_call.1
= control target key start
LH: loop header
LB: loop body
LE: loop exit
PB: predicated region body
PF: predicated region fallthrough
CT: control target
= control target key end

     0   :  { %s2800_s0 = inlined_call_operand.vmem [shape: f32[2,128], index: 0, kind: input, shape index: {}]   ;;  %s2801_s1 = inlined_call_operand.vmem [shape: f32[32,2], index: 1, kind: input, shape index: {}]   ;;  %s2802_s2 = inlined_call_operand.vmem [shape: f32[32,1], index: 2, kind: input, shape index: {}]   ;;  %s2803_s3 = inlined_call_operand.vmem [shape: f32[32,32], index: 3, kind: input, shape index: {}]   ;;  %s2804_s4 = inlined_call_operand.vmem [shape: f32[32,1], index: 4, kind: input, shape index: {}]   ;;  %s2805_s5 = inlined_call_operand.vmem [shape: f32[32,32], index: 5, kind: input, shape index: {}]   ;;  %s2806_s6 = inlined_call_operand.vmem [shape: f32[32,1], index: 6, kind: input, shape index: {}]   ;;  %s2807_s7 = inlined_call_operand.vmem [shape: f32[1,32], index: 7, kind: input, shape index: {}]   ;;  %s2808_s8 = inlined_call_operand.<no memory space> [shape: f32[1,1], index: 8, kind: input, shape index: {}]   ;;  %s2809_s9 = inlined_call_operand.hbm [shape: f32[1,128], index: 9, kind: output, shape index: {}]  }
   0x1   :  { %v14_v0 = vstv %s2808_s8 }
   0x2   :  { %15 = vst [vmem:[#allocation2] sm:$0x1] %v14_v0 }
   0x3   :  { %v38_v1 = vld [vmem:[%s2801_s1 + $0x18] sm:$0xff]  ;;  %v37_v2 = vld [vmem:[%s2801_s1 + $0x10] sm:$0xff]  ;;  %v2377_v3 = vmov 1   ;;  %v2378_v4 = vmov 0   ;;  %v36_v5 = vld [vmem:[%s2801_s1 + $0x8] sm:$0xff] }
   0x4   :  { %2324 = vset.pattern.permute.xlu0 %v2377_v3  ;;  %2325 = vset.pattern.permute.xlu1 %v2378_v4 }
   0x5   :  { %103 = vperm.xlu0 %2324, %v38_v1   ;;  %74 = vperm.xlu1 %2325, %v37_v2  }
   0x9   :  { %2326 = vset.pattern.permute.xlu1 %v2377_v3  ;;  %95 = vperm.xlu0 %2324, %v36_v5  }
   0xa   :  { %16 = vsyncpa [#allocation4], 0  ;;  %99 = vperm.xlu1 %2326, %v37_v2   ;;  %v35_v6 = vld [vmem:[%s2801_s1] sm:$0xff]  ;;  %v51_v7 = vld [vmem:[%s2802_s2 + $0x18] sm:$0xff]  ;;  %vm166_vm0 = vcmask 261120   ;;  %v82_v27 = vlaneseq  ;;  %vm2380_vm1 = vmmov 0  }
   0xb   :  { %v49_v8 = vld [vmem:[%s2802_s2 + $0x8] sm:$0xff]  ;;  %v55_v9 = vld [vmem:[%s2804_s4 + $0x18] sm:$0xff]  ;;  %v50_v10 = vld [vmem:[%s2802_s2 + $0x10] sm:$0xff] }
   0xc   :  { %v53_v11 = vld [vmem:[%s2804_s4 + $0x8] sm:$0xff]  ;;  %v48_v12 = vld [vmem:[%s2802_s2] sm:$0xff]  ;;  %v59_v13 = vld [vmem:[%s2806_s6 + $0x18] sm:$0xff]  ;;  %v2497_v28 = vshrl.u32 %v82_v27, 7 }
   0xd   :  { %2328 = vset.pattern.permute.xlu0 %v2378_v4  ;;  %v54_v14 = vld [vmem:[%s2804_s4 + $0x10] sm:$0xff]  ;;  %v57_v15 = vld [vmem:[%s2806_s6 + $0x8] sm:$0xff]  ;;  %v39_v16 = vld [vmem:[%s2803_s3] sm:$0xff] }
   0xe   :  { %2327 = vset.pattern.permute.xlu1 %v2378_v4  ;;  %79 = vperm.xlu0 %2328, %v38_v1   ;;  %v168_v17 = vsel %vm166_vm0, %v39_v16, 0  ;;  %v52_v18 = vld [vmem:[%s2804_s4] sm:$0xff]  ;;  %v58_v22 = vld [vmem:[%s2806_s6 + $0x10] sm:$0xff]  ;;  %v108_v31 = vsub.s32 1, %v2497_v28  ;;  %v84_v32 = vsub.s32 0, %v2497_v28  ;;  %v40_v57 = vld [vmem:[%s2803_s3 + $0x8] sm:$0xff] }
   0xf   :  { %69 = vperm.xlu1 %2327, %v36_v5   ;;  %v2481_v19 = vand.u32 4294901760, %v168_v17  ;;  %v60_v20 = vld [vmem:[#allocation2] sm:$0x1]  ;;  %v41_v59 = vld [vmem:[%s2803_s3 + $0x10] sm:$0xff]  ;;  %v171_v61 = vsel %vm166_vm0, %v40_v57, 0  ;;  %v42_v0 = vld [vmem:[%s2803_s3 + $0x18] sm:$0xff] }
  0x10   :  { %v56_v25 = vld [vmem:[%s2806_s6] sm:$0xff]  ;;  %v174_v63 = vsel %vm166_vm0, %v41_v59, 0 }
  0x11   :  { %v2484_v21 = vsub.f32 %v168_v17, %v2481_v19  ;;  %2107 = vmatprep.mubr.f32.mxu1 %v2481_v19  ;;  %v61_v34 = vld [vmem:[%s2800_s0] sm:$0x3]  ;;  %v2519_v5 = vand.u32 4294901760, %v174_v63 }
  0x12   :  { %64 = vperm.xlu0 %2328, %v35_v6   ;;  %v109_v36 = vrot.slane %v61_v34, %v108_v31  ;;  %v85_v37 = vrot.slane %v61_v34, %v84_v32 }
  0x13   :  { %135 = vperm.xlu1 %2327, %v51_v7   ;;  %v250_v23 = vand.u32 4294901760, %v2484_v21 }
  0x15   :  { %v251_v24 = vsub.f32 %v2484_v21, %v250_v23 }
  0x16   :  { %125 = vperm.xlu0 %2328, %v49_v8  }
  0x17   :  { %2329 = vset.pattern.permute.xlu1 %v2377_v3  ;;  %v252_v26 = vand.u32 4294901760, %v251_v24  ;;  %v2517_v3 = vand.u32 4294901760, %v171_v61 }
  0x18   :  { %91 = vperm.xlu1 %2329, %v35_v6   ;;  %v177_v6 = vsel %vm166_vm0, %v42_v0, 0 }
  0x19   :  { %2093 = vmatprep.mubr.f32.mxu0 %v252_v26 }
  0x1a   :  { %163 = vperm.xlu0 %2328, %v55_v9  }
  0x1c   :  { %2330 = vset.pattern.permute.xlu1 %v2378_v4 }
  0x1d   :  { %130 = vperm.xlu1 %2330, %v50_v10   ;;  %v2527_v10 = vsub.f32 %v171_v61, %v2517_v3 }
  0x1e   :  { %153 = vperm.xlu0 %2328, %v53_v11   ;;  %v2529_v11 = vand.u32 4294901760, %v177_v6 }
  0x1f   :  { %v260_v16 = vand.u32 4294901760, %v2527_v10 }
  0x20   :  { %v2539_v17 = vsub.f32 %v177_v6, %v2529_v11 }
  0x21   :  { %120 = vperm.xlu1 %2330, %v48_v12   ;;  %v2533_v12 = vsub.f32 %v174_v63, %v2519_v5  ;;  %v261_v26 = vsub.f32 %v2527_v10, %v260_v16 }
  0x22   :  { %814 = vperm.xlu0 %2328, %v59_v13   ;;  %v280_v27 = vand.u32 4294901760, %v2539_v17 }
  0x25   :  { %158 = vperm.xlu1 %2330, %v54_v14  }
  0x26   :  { %804 = vperm.xlu0 %2328, %v57_v15  }
  0x29   :  { %148 = vperm.xlu1 %2330, %v52_v18   ;;  %v270_v18 = vand.u32 4294901760, %v2533_v12 }
  0x2a   :  { %1449 = vperm.xlu0 %2328, %v60_v20  }
  0x2d   :  { %809 = vperm.xlu1 %2330, %v58_v22  }
  0x31   :  { %799 = vperm.xlu1 %2330, %v56_v25  }
  0x80   :  { %v75_v29 = vpop.permute.xlu1 %74  ;;  %v104_v30 = vpop.permute.xlu0 %103 }
  0x81   :  { %v113_v38 = vmul.f32 %v109_v36, %v104_v30  ;;  %v88_v53 = vmul.f32 %v85_v37, %v75_v29  ;;  %v271_v29 = vsub.f32 %v2533_v12, %v270_v18 }
  0x84   :  { %v96_v33 = vpop.permute.xlu0 %95 }
  0x85   :  { %v100_v35 = vpop.permute.xlu1 %99  ;;  %v111_v42 = vmul.f32 %v109_v36, %v96_v33 }
  0x86   :  { %v112_v51 = vmul.f32 %v109_v36, %v100_v35  ;;  %v262_v35 = vand.u32 4294901760, %v261_v26 }
  0x88   :  { %v116_v56 = vadd.f32 %v112_v51, %v88_v53 }
  0x89   :  { %v80_v39 = vpop.permute.xlu0 %79 }
  0x8a   :  { %v89_v40 = vmul.f32 %v85_v37, %v80_v39  ;;  %v70_v41 = vpop.permute.xlu1 %69 }
  0x8b   :  { %v87_v43 = vmul.f32 %v85_v37, %v70_v41 }
  0x8c   :  { %v117_v44 = vadd.f32 %v113_v38, %v89_v40  ;;  %v272_v38 = vand.u32 4294901760, %v271_v29 }
  0x8d   :  { %v65_v45 = vpop.permute.xlu0 %64  ;;  %v115_v48 = vadd.f32 %v111_v42, %v87_v43 }
  0x8e   :  { %v136_v46 = vpop.permute.xlu1 %135  ;;  %v86_v54 = vmul.f32 %v85_v37, %v65_v45  ;;  %v281_v37 = vsub.f32 %v2539_v17, %v280_v27 }
  0x8f   :  { %v141_v47 = vadd.f32 %v136_v46, %v117_v44 }
  0x90   :  { %v282_v43 = vand.u32 4294901760, %v281_v37 }
  0x91   :  { %2331 = vtanh.f32 %v141_v47  ;;  %v126_v49 = vpop.permute.xlu0 %125 }
  0x92   :  { %v139_v50 = vadd.f32 %v126_v49, %v115_v48 }
  0x93   :  { %v92_v52 = vpop.permute.xlu1 %91 }
  0x94   :  { %2333 = vtanh.f32 %v139_v50  ;;  %v110_v55 = vmul.f32 %v109_v36, %v92_v52 }
  0x95   :  { %v164_v57 = vpop.permute.xlu0 %163 }
  0x96   :  { %v114_v62 = vadd.f32 %v110_v55, %v86_v54 }
  0x98   :  { %v131_v58 = vpop.permute.xlu1 %130 }
  0x99   :  { %v140_v60 = vadd.f32 %v131_v58, %v116_v56  ;;  %v154_v63 = vpop.permute.xlu0 %153 }
  0x9b   :  { %2335 = vtanh.f32 %v140_v60 }
  0x9c   :  { %v121_v1 = vpop.permute.xlu1 %120 }
  0x9d   :  { %v138_v2 = vadd.f32 %v121_v1, %v114_v62 }
  0x9e   :  { %v2332_v4 = vpop.eup %2331 }
  0x9f   :  { %v2522_v7 = vand.u32 4294901760, %v2332_v4  ;;  %2337 = vtanh.f32 %v138_v2 }
  0xa0   :  { %v159_v60 = vpop.permute.xlu1 %158 }
  0xa1   :  { %v2334_v8 = vpop.eup %2333  ;;  %2085 = vmatprep.subr.mxu0 %v2522_v7  ;;  %v314_v9 = vsub.f32 %v2332_v4, %v2522_v7 }
  0xa2   :  { %2086 = vmatpush3.msra.mxu0 %v2522_v7  ;;  %v2535_v13 = vand.u32 4294901760, %v2334_v8 }
  0xa3   :  { %v315_v14 = vand.u32 4294901760, %v314_v9 }
  0xa4   :  { %v328_v22 = vsub.f32 %v2334_v8, %v2535_v13  ;;  %v149_v2 = vpop.permute.xlu1 %148 }
  0xa5   :  { %v316_v15 = vsub.f32 %v314_v9, %v315_v14 }
  0xa6   :  { %v329_v31 = vand.u32 4294901760, %v328_v22 }
  0xa7   :  { %v317_v20 = vand.u32 4294901760, %v316_v15 }
  0xa8   :  { %v2336_v24 = vpop.eup %2335  ;;  %v330_v40 = vsub.f32 %v328_v22, %v329_v31 }
  0xa9   :  { %v2543_v25 = vand.u32 4294901760, %v2336_v24  ;;  %2099 = vmatprep.subr.mxu1 %v317_v20 }
  0xaa   :  { %2100 = vmatpush3.msra.mxu1 %v317_v20  ;;  %v331_v45 = vand.u32 4294901760, %v330_v40 }
  0xab   :  { %2087 = vmatprep.subr.mxu0 %v2543_v25  ;;  %v321_v30 = vsub.f32 %v2336_v24, %v2543_v25 }
  0xac   :  { %v2338_v33 = vpop.eup %2337  ;;  %2088 = vmatpush3.msra.mxu0 %v2543_v25 }
  0xad   :  { %v2555_v34 = vand.u32 4294901760, %v2338_v33  ;;  %2089 = vmatprep.subr.mxu0 %v2535_v13  ;;  %v322_v36 = vand.u32 4294901760, %v321_v30 }
  0xae   :  { %2090 = vmatpush3.msra.mxu0 %v2535_v13 }
  0xaf   :  { %2091 = vmatprep.subr.mxu0 %v2555_v34  ;;  %v323_v39 = vsub.f32 %v321_v30, %v322_v36  ;;  %v335_v41 = vsub.f32 %v2338_v33, %v2555_v34 }
  0xb0   :  { %2092 = vmatpush3.msra.mxu0 %v2555_v34 }
  0xb1   :  { %2094 = vmatmul.mubr.f32.vlgmr.msra.gmra.mxu0 %v262_v35  ;;  %2113 = vmatprep.subr.mxu0 %v314_v9  ;;  %v324_v42 = vand.u32 4294901760, %v323_v39  ;;  %v336_v44 = vand.u32 4294901760, %v335_v41 }
  0xb2   :  { %2114 = vmatpush3.msra.mxu0 %v314_v9  ;;  %2096 = vmatprep.mubr.f32.mxu0 %v272_v38 }
  0xb3   :  { %2101 = vmatprep.subr.mxu1 %v324_v42  ;;  %2115 = vmatprep.subr.mxu0 %v321_v30  ;;  %v337_v46 = vsub.f32 %v335_v41, %v336_v44 }
  0xb4   :  { %2102 = vmatpush3.msra.mxu1 %v324_v42  ;;  %2116 = vmatpush3.msra.mxu0 %v321_v30 }
  0xb5   :  { %2097 = vmatmul.mubr.f32.gmra.mxu0 %v282_v43  ;;  %2103 = vmatprep.subr.mxu1 %v331_v45  ;;  %v338_v47 = vand.u32 4294901760, %v337_v46  ;;  %v44_v43 = vld [vmem:[%s2805_s5 + $0x8] sm:$0xff] }
  0xb6   :  { %2117 = vmatprep.subr.mxu0 %v328_v22  ;;  %2104 = vmatpush3.msra.mxu1 %v331_v45  ;;  %v821_v46 = vsel %vm166_vm0, %v44_v43, 0 }
  0xb7   :  { %2118 = vmatpush3.msra.mxu0 %v328_v22  ;;  %2105 = vmatprep.subr.mxu1 %v338_v47 }
  0xb8   :  { %2119 = vmatprep.subr.mxu0 %v335_v41  ;;  %2106 = vmatpush3.msra.mxu1 %v338_v47  ;;  %v45_v47 = vld [vmem:[%s2805_s5 + $0x10] sm:$0xff] }
  0xb9   :  { %2120 = vmatpush3.msra.mxu0 %v335_v41  ;;  %2108 = vmatmul.mubr.f32.vlgmr.msra.gmra.mxu1 %v2517_v3 }
  0xba   :  { %2121 = vmatprep.mubr.f32.mxu0 %v2484_v21  ;;  %2127 = vmatprep.subr.mxu1 %v2522_v7  ;;  %v43_v21 = vld [vmem:[%s2805_s5] sm:$0xff] }
  0xbb   :  { %2141 = vmatprep.subr.mxu0 %v315_v14  ;;  %2122 = vmatmul.mubr.f32.vlgmr.msra.gmra.mxu0 %v2527_v10 }
  0xbc   :  { %2128 = vmatpush3.msra.mxu1 %v2522_v7  ;;  %2142 = vmatpush3.msra.mxu0 %v315_v14 }
  0xbd   :  { %2129 = vmatprep.subr.mxu1 %v2543_v25  ;;  %2143 = vmatprep.subr.mxu0 %v322_v36 }
  0xbe   :  { %2110 = vmatprep.mubr.f32.mxu1 %v2519_v5  ;;  %2130 = vmatpush3.msra.mxu1 %v2543_v25 }
  0xbf   :  { %2144 = vmatpush3.msra.mxu0 %v322_v36  ;;  %2111 = vmatmul.mubr.f32.gmra.mxu1 %v2529_v11 }
  0xc0   :  { %2131 = vmatprep.subr.mxu1 %v2535_v13  ;;  %2145 = vmatprep.subr.mxu0 %v329_v31 }
  0xc1   :  { %2124 = vmatprep.mubr.f32.mxu0 %v2533_v12  ;;  %2132 = vmatpush3.msra.mxu1 %v2535_v13 }
  0xc2   :  { %2146 = vmatpush3.msra.mxu0 %v329_v31  ;;  %2133 = vmatprep.subr.mxu1 %v2555_v34 }
  0xc3   :  { %2125 = vmatmul.mubr.f32.gmra.mxu0 %v2539_v17  ;;  %2147 = vmatprep.subr.mxu0 %v336_v44 }
  0xc4   :  { %2134 = vmatpush3.msra.mxu1 %v2555_v34  ;;  %2135 = vmatprep.mubr.f32.mxu1 %v250_v23  ;;  %v818_v23 = vsel %vm166_vm0, %v43_v21, 0  ;;  %v46_v21 = vld [vmem:[%s2805_s5 + $0x18] sm:$0xff] }
  0xc5   :  { %2148 = vmatpush3.msra.mxu0 %v336_v44  ;;  %2136 = vmatmul.mubr.f32.vlgmr.msra.gmra.mxu1 %v260_v16  ;;  %v2608_v48 = vand.u32 4294901760, %v818_v23 }
  0xc6   :  { %2155 = vmatprep.subr.mxu1 %v2522_v7  ;;  %2149 = vmatprep.mubr.f32.mxu0 %v2481_v19 }
  0xc7   :  { %2156 = vmatpush3.msra.mxu1 %v2522_v7  ;;  %2150 = vmatmul.mubr.f32.vlgmr.msra.gmra.mxu0 %v2517_v3  ;;  %v2611_v49 = vsub.f32 %v818_v23, %v2608_v48  ;;  %v2628_v23 = vand.u32 4294901760, %v821_v46 }
  0xc8   :  { %2157 = vmatprep.subr.mxu1 %v2543_v25  ;;  %2138 = vmatprep.mubr.f32.mxu1 %v270_v18 }
  0xc9   :  { %2158 = vmatpush3.msra.mxu1 %v2543_v25  ;;  %2152 = vmatprep.mubr.f32.mxu0 %v2519_v5 }
  0xca   :  { %2139 = vmatmul.mubr.f32.gmra.mxu1 %v280_v27  ;;  %2159 = vmatprep.subr.mxu1 %v2535_v13 }
  0xcb   :  { %2160 = vmatpush3.msra.mxu1 %v2535_v13  ;;  %2153 = vmatmul.mubr.f32.gmra.mxu0 %v2529_v11 }
  0xcc   :  { %2161 = vmatprep.subr.mxu1 %v2555_v34  ;;  %2163 = vmatprep.mubr.f32.mxu1 %v2481_v19  ;;  %v900_v19 = vand.u32 4294901760, %v2611_v49 }
  0xcd   :  { %2162 = vmatpush3.msra.mxu1 %v2555_v34 }
  0xce   :  { %2164 = vmatmul.mubr.f32.vlgmr.msra.gmra.mxu1 %v2517_v3  ;;  %v901_v50 = vsub.f32 %v2611_v49, %v900_v19 }
  0xcf   :  { %2166 = vmatprep.mubr.f32.mxu1 %v2519_v5 }
  0xd0   :  { %v902_v51 = vand.u32 4294901760, %v901_v50  ;;  %v824_v50 = vsel %vm166_vm0, %v45_v47, 0 }
  0xd2   :  { %2167 = vmatmul.mubr.f32.gmra.mxu1 %v2529_v11  ;;  %2177 = vmatprep.mubr.f32.mxu0 %v902_v51  ;;  %v827_v51 = vsel %vm166_vm0, %v46_v21, 0 }
  0xd3   :  { %2191 = vmatprep.mubr.f32.mxu1 %v2608_v48 }
 0x171   :  { %v2095_v52 = vpop.f32.mrf.mxu0 }
 0x172   :  { %v265_v0 = vadd.f32 %v2095_v52, %v154_v63  ;;  %v2632_v52 = vand.u32 4294901760, %v824_v50 }
 0x173   :  { %v254_v53 = vpop.f32.mrf.mxu0 }
 0x174   :  { %v255_v3 = vadd.f32 %v254_v53, %v149_v2  ;;  %v2635_v53 = vsub.f32 %v821_v46, %v2628_v23 }
 0x175   :  { %v2098_v54 = vpop.f32.mrf.mxu0 }
 0x176   :  { %v285_v6 = vadd.f32 %v2098_v54, %v164_v57 }
 0x177   :  { %v274_v55 = vpop.f32.mrf.mxu0 }
 0x178   :  { %v275_v10 = vadd.f32 %v274_v55, %v159_v60  ;;  %v2637_v55 = vand.u32 4294901760, %v827_v51 }
 0x179   :  { %v2109_v56 = vpop.f32.mrf.mxu1 }
 0x17a   :  { %v382_v4 = vadd.f32 %v2109_v56, %v265_v0 }
 0x17b   :  { %v375_v58 = vpop.f32.mrf.mxu1  ;;  %v2123_v59 = vpop.f32.mrf.mxu0 }
 0x17c   :  { %v376_v7 = vadd.f32 %v375_v58, %v255_v3  ;;  %v481_v11 = vadd.f32 %v2123_v59, %v382_v4  ;;  %v2642_v58 = vsub.f32 %v824_v50, %v2632_v52  ;;  %v910_v59 = vand.u32 4294901760, %v2635_v53 }
 0x17d   :  { %v473_v62 = vpop.f32.mrf.mxu0 }
 0x17e   :  { %v474_v15 = vadd.f32 %v473_v62, %v376_v7  ;;  %v2648_v62 = vsub.f32 %v827_v51, %v2637_v55  ;;  %v911_v4 = vsub.f32 %v2635_v53, %v910_v59 }
 0x17f   :  { %v2112_v61 = vpop.f32.mrf.mxu1 }
 0x180   :  { %v394_v12 = vadd.f32 %v2112_v61, %v285_v6  ;;  %v930_v6 = vand.u32 4294901760, %v2648_v62 }
 0x181   :  { %v387_v1 = vpop.f32.mrf.mxu1 }
 0x182   :  { %v388_v16 = vadd.f32 %v387_v1, %v275_v10  ;;  %v920_v1 = vand.u32 4294901760, %v2642_v58 }
 0x183   :  { %v2126_v5 = vpop.f32.mrf.mxu0 }
 0x184   :  { %v495_v22 = vadd.f32 %v2126_v5, %v394_v12  ;;  %v921_v10 = vsub.f32 %v2642_v58, %v920_v1  ;;  %v912_v12 = vand.u32 4294901760, %v911_v4 }
 0x185   :  { %v487_v8 = vpop.f32.mrf.mxu0  ;;  %v2137_v9 = vpop.f32.mrf.mxu1 }
 0x186   :  { %v580_v17 = vadd.f32 %v2137_v9, %v481_v11  ;;  %v488_v27 = vadd.f32 %v487_v8, %v388_v16 }
 0x187   :  { %v571_v13 = vpop.f32.mrf.mxu1  ;;  %v2151_v14 = vpop.f32.mrf.mxu0 }
 0x188   :  { %v572_v24 = vadd.f32 %v571_v13, %v474_v15  ;;  %v685_v29 = vadd.f32 %v2151_v14, %v580_v17  ;;  %v931_v15 = vsub.f32 %v2648_v62, %v930_v6 }
 0x189   :  { %v678_v18 = vpop.f32.mrf.mxu0 }
 0x18a   :  { %v2140_v20 = vpop.f32.mrf.mxu1  ;;  %v679_v33 = vadd.f32 %v678_v18, %v572_v24 }
 0x18b   :  { %v2154_v26 = vpop.f32.mrf.mxu0  ;;  %v596_v30 = vadd.f32 %v2140_v20, %v495_v22  ;;  %v922_v20 = vand.u32 4294901760, %v921_v10 }
 0x18c   :  { %v587_v25 = vpop.f32.mrf.mxu1 }
 0x18d   :  { %v588_v34 = vadd.f32 %v587_v25, %v488_v27  ;;  %v690_v36 = vpop.f32.mrf.mxu0  ;;  %v697_v38 = vadd.f32 %v2154_v26, %v596_v30  ;;  %v932_v25 = vand.u32 4294901760, %v931_v15 }
 0x18e   :  { %v2165_v31 = vpop.f32.mrf.mxu1 }
 0x18f   :  { %v778_v35 = vadd.f32 %v2165_v31, %v685_v29  ;;  %v691_v41 = vadd.f32 %v690_v36, %v588_v34  ;;  %v815_v34 = vpop.permute.xlu0 %814 }
 0x190   :  { %v771_v37 = vpop.f32.mrf.mxu1 }
 0x191   :  { %2339 = vtanh.f32 %v778_v35  ;;  %v772_v39 = vadd.f32 %v771_v37, %v679_v33  ;;  %v810_v37 = vpop.permute.xlu1 %809 }
 0x192   :  { %v2168_v40 = vpop.f32.mrf.mxu1 }
 0x193   :  { %2341 = vtanh.f32 %v772_v39  ;;  %v790_v42 = vadd.f32 %v2168_v40, %v697_v38  ;;  %v805_v40 = vpop.permute.xlu0 %804 }
 0x194   :  { %v783_v44 = vpop.f32.mrf.mxu1 }
 0x195   :  { %2343 = vtanh.f32 %v790_v42  ;;  %v784_v45 = vadd.f32 %v783_v44, %v691_v41  ;;  %v800_v43 = vpop.permute.xlu1 %799 }
 0x197   :  { %2345 = vtanh.f32 %v784_v45 }
 0x19e   :  { %v2340_v54 = vpop.eup %2339 }
 0x19f   :  { %v2639_v57 = vand.u32 4294901760, %v2340_v54 }
 0x1a0   :  { %v2342_v56 = vpop.eup %2341 }
 0x1a1   :  { %v2645_v61 = vand.u32 4294901760, %v2342_v56  ;;  %v978_v2 = vsub.f32 %v2340_v54, %v2639_v57 }
 0x1a2   :  { %v2344_v60 = vpop.eup %2343 }
 0x1a3   :  { %v2650_v63 = vand.u32 4294901760, %v2344_v60  ;;  %v985_v7 = vsub.f32 %v2342_v56, %v2645_v61  ;;  %v979_v11 = vand.u32 4294901760, %v978_v2 }
 0x1a4   :  { %v2346_v0 = vpop.eup %2345 }
 0x1a5   :  { %v2654_v3 = vand.u32 4294901760, %v2346_v0  ;;  %2169 = vmatprep.subr.mxu0 %v2650_v63  ;;  %v964_v5 = vsub.f32 %v2344_v60, %v2650_v63  ;;  %v986_v16 = vand.u32 4294901760, %v985_v7  ;;  %v980_v22 = vsub.f32 %v978_v2, %v979_v11 }
 0x1a6   :  { %2170 = vmatpush3.msra.mxu0 %v2650_v63 }
 0x1a7   :  { %2171 = vmatprep.subr.mxu0 %v2654_v3  ;;  %v965_v8 = vand.u32 4294901760, %v964_v5  ;;  %v971_v9 = vsub.f32 %v2346_v0, %v2654_v3  ;;  %v987_v26 = vsub.f32 %v985_v7, %v986_v16  ;;  %v981_v27 = vand.u32 4294901760, %v980_v22 }
 0x1a8   :  { %2172 = vmatpush3.msra.mxu0 %v2654_v3 }
 0x1a9   :  { %2173 = vmatprep.subr.mxu0 %v2639_v57  ;;  %v966_v13 = vsub.f32 %v964_v5, %v965_v8  ;;  %v972_v14 = vand.u32 4294901760, %v971_v9  ;;  %v988_v29 = vand.u32 4294901760, %v987_v26 }
 0x1aa   :  { %2174 = vmatpush3.msra.mxu0 %v2639_v57 }
 0x1ab   :  { %2175 = vmatprep.subr.mxu0 %v2645_v61  ;;  %v967_v17 = vand.u32 4294901760, %v966_v13  ;;  %v973_v18 = vsub.f32 %v971_v9, %v972_v14  ;;  %v47_v13 = vld [vmem:[%s2807_s7] sm:$0x1]  ;;  %s2381_s7 = smov [#allocation3]  }
 0x1ac   :  { %2176 = vmatpush3.msra.mxu0 %v2645_v61  ;;  %s1951_s11 = sshll.u32 %s2381_s7, 4  ;;  %s1952_s11 = int_to_ptr.vmem [resolvable:$true] %s1951_s11 }
 0x1ad   :  { %2178 = vmatmul.mubr.f32.vlgmr.msra.gmra.mxu0 %v912_v12  ;;  %2183 = vmatprep.subr.mxu1 %v967_v17  ;;  %v974_v24 = vand.u32 4294901760, %v973_v18  ;;  %v1457_v18 = vsel %vm166_vm0, %v47_v13, 0  ;;  %s2355_s12 = scalar_lea.vmem %s1952_s11, 16  ;;  %s2359_s13 = scalar_lea.vmem %s1952_s11, 32 }
 0x1ae   :  { %2197 = vmatprep.subr.mxu0 %v964_v5  ;;  %2184 = vmatpush3.msra.mxu1 %v967_v17  ;;  %p2356_p0 = scmp.ne.s32.totalorder %s1952_s11, %s2355_s12  ;;  %p2360_p1 = scmp.lt.s32.totalorder %s1952_s11, %s1952_s11 }
 0x1af   :  { %2198 = vmatpush3.msra.mxu0 %v964_v5  ;;  %2185 = vmatprep.subr.mxu1 %v974_v24  ;;  %p2361_p2 = scmp.lt.s32.totalorder %s2359_s13, %s2355_s12 }
 0x1b0   :  { %2199 = vmatprep.subr.mxu0 %v971_v9  ;;  %2180 = vmatprep.mubr.f32.mxu0 %v922_v20  ;;  %v2726_v20 = vand.u32 4294901760, %v1457_v18 }
 0x1b1   :  { %2186 = vmatpush3.msra.mxu1 %v974_v24  ;;  %2200 = vmatpush3.msra.mxu0 %v971_v9  ;;  %p2362_p3 = por %p2361_p2, %p2360_p1 }
 0x1b2   :  { %2181 = vmatmul.mubr.f32.gmra.mxu0 %v932_v25  ;;  %2187 = vmatprep.subr.mxu1 %v981_v27  ;;  %v2729_v22 = vsub.f32 %v1457_v18, %v2726_v20 }
 0x1b3   :  { %2201 = vmatprep.subr.mxu0 %v978_v2  ;;  %2188 = vmatpush3.msra.mxu1 %v981_v27  ;;  %p2363_p4 = pnand %p2362_p3, %p2356_p0 }
 0x1b4   :  { %2202 = vmatpush3.msra.mxu0 %v978_v2  ;;  %2189 = vmatprep.subr.mxu1 %v988_v29  ;;  %v1530_v27 = vand.u32 4294901760, %v2729_v22 }
 0x1b5   :  { %2203 = vmatprep.subr.mxu0 %v985_v7  ;;  %2190 = vmatpush3.msra.mxu1 %v988_v29 }
 0x1b6   :  { %2204 = vmatpush3.msra.mxu0 %v985_v7  ;;  %2192 = vmatmul.mubr.f32.vlgmr.msra.gmra.mxu1 %v2628_v23 }
 0x1b7   :  { %2205 = vmatprep.mubr.f32.mxu0 %v2611_v49  ;;  %2211 = vmatprep.subr.mxu1 %v2650_v63  ;;  %v2379_v49 = vmov 0.0  }
 0x1b8   :  { %2225 = vmatprep.subr.mxu0 %v965_v8  ;;  %2206 = vmatmul.mubr.f32.vlgmr.msra.gmra.mxu0 %v2635_v53 }
 0x1b9   :  { %2212 = vmatpush3.msra.mxu1 %v2650_v63  ;;  %2226 = vmatpush3.msra.mxu0 %v965_v8 }
 0x1ba   :  { %2213 = vmatprep.subr.mxu1 %v2654_v3  ;;  %2227 = vmatprep.subr.mxu0 %v972_v14 }
 0x1bb   :  { %2194 = vmatprep.mubr.f32.mxu1 %v2632_v52  ;;  %2214 = vmatpush3.msra.mxu1 %v2654_v3 }
 0x1bc   :  { %2228 = vmatpush3.msra.mxu0 %v972_v14  ;;  %2195 = vmatmul.mubr.f32.gmra.mxu1 %v2637_v55 }
 0x1bd   :  { %2215 = vmatprep.subr.mxu1 %v2639_v57  ;;  %2229 = vmatprep.subr.mxu0 %v979_v11 }
 0x1be   :  { %2208 = vmatprep.mubr.f32.mxu0 %v2642_v58  ;;  %2216 = vmatpush3.msra.mxu1 %v2639_v57 }
 0x1bf   :  { %2230 = vmatpush3.msra.mxu0 %v979_v11  ;;  %2217 = vmatprep.subr.mxu1 %v2645_v61 }
 0x1c0   :  { %2209 = vmatmul.mubr.f32.gmra.mxu0 %v2648_v62  ;;  %2231 = vmatprep.subr.mxu0 %v986_v16 }
 0x1c1   :  { %2218 = vmatpush3.msra.mxu1 %v2645_v61  ;;  %2219 = vmatprep.mubr.f32.mxu1 %v900_v19 }
 0x1c2   :  { %2232 = vmatpush3.msra.mxu0 %v986_v16  ;;  %2220 = vmatmul.mubr.f32.vlgmr.msra.gmra.mxu1 %v910_v59 }
 0x1c3   :  { %2239 = vmatprep.subr.mxu1 %v2650_v63  ;;  %2233 = vmatprep.mubr.f32.mxu0 %v2608_v48 }
 0x1c4   :  { %2240 = vmatpush3.msra.mxu1 %v2650_v63  ;;  %2234 = vmatmul.mubr.f32.vlgmr.msra.gmra.mxu0 %v2628_v23 }
 0x1c5   :  { %2241 = vmatprep.subr.mxu1 %v2654_v3  ;;  %2222 = vmatprep.mubr.f32.mxu1 %v920_v1 }
 0x1c6   :  { %2242 = vmatpush3.msra.mxu1 %v2654_v3  ;;  %2236 = vmatprep.mubr.f32.mxu0 %v2632_v52 }
 0x1c7   :  { %2223 = vmatmul.mubr.f32.gmra.mxu1 %v930_v6  ;;  %2243 = vmatprep.subr.mxu1 %v2639_v57 }
 0x1c8   :  { %2244 = vmatpush3.msra.mxu1 %v2639_v57  ;;  %2237 = vmatmul.mubr.f32.gmra.mxu0 %v2637_v55 }
 0x1c9   :  { %2245 = vmatprep.subr.mxu1 %v2645_v61  ;;  %2247 = vmatprep.mubr.f32.mxu1 %v2608_v48 }
 0x1ca   :  { %2246 = vmatpush3.msra.mxu1 %v2645_v61  ;;  %2253 = vmatprep.subr.mxu0 %v2379_v49 }
 0x1cb   :  { %2248 = vmatmul.mubr.f32.vlgmr.msra.gmra.mxu1 %v2628_v23  ;;  %2264 = vmatprep.subr.mxu1 %v2379_v49 }
 0x1cc   :  { %2250 = vmatprep.mubr.f32.mxu1 %v2632_v52  ;;  %2261 = vmatprep.mubr.msk.f32.mxu0 %vm2380_vm1, %v2379_v49 }
 0x1cf   :  { %2251 = vmatmul.mubr.f32.gmra.mxu1 %v2637_v55 }
 0x1d0   :  { %2272 = vmatprep.mubr.msk.f32.mxu1 %vm2380_vm1, %v2379_v49 }
 0x26d   :  { %v2179_v48 = vpop.f32.mrf.mxu0 }
 0x26e   :  { %v915_v41 = vadd.f32 %v2179_v48, %v805_v40 }
 0x26f   :  { %v904_v19 = vpop.f32.mrf.mxu0 }
 0x270   :  { %v905_v44 = vadd.f32 %v904_v19, %v800_v43 }
 0x272   :  { %v2182_v30 = vpop.f32.mrf.mxu0 }
 0x273   :  { %v935_v47 = vadd.f32 %v2182_v30, %v815_v34 }
 0x274   :  { %v924_v31 = vpop.f32.mrf.mxu0 }
 0x275   :  { %v925_v51 = vadd.f32 %v924_v31, %v810_v37 }
 0x276   :  { %v2193_v33 = vpop.f32.mrf.mxu1 }
 0x277   :  { %v1032_v45 = vadd.f32 %v2193_v33, %v915_v41  ;;  %v1531_v33 = vsub.f32 %v2729_v22, %v1530_v27 }
 0x278   :  { %v1025_v35 = vpop.f32.mrf.mxu1  ;;  %v2207_v36 = vpop.f32.mrf.mxu0 }
 0x279   :  { %v1026_v21 = vadd.f32 %v1025_v35, %v905_v44  ;;  %v1131_v52 = vadd.f32 %v2207_v36, %v1032_v45  ;;  %v1532_v40 = vand.u32 4294901760, %v1531_v33 }
 0x27a   :  { %v1123_v39 = vpop.f32.mrf.mxu0 }
 0x27b   :  { %v1124_v56 = vadd.f32 %v1123_v39, %v1026_v21 }
 0x27c   :  { %v2196_v38 = vpop.f32.mrf.mxu1 }
 0x27d   :  { %v1044_v53 = vadd.f32 %v2196_v38, %v935_v47 }
 0x27e   :  { %v1037_v42 = vpop.f32.mrf.mxu1 }
 0x27f   :  { %v1038_v57 = vadd.f32 %v1037_v42, %v925_v51 }
 0x280   :  { %v2210_v46 = vpop.f32.mrf.mxu0 }
 0x281   :  { %v1145_v61 = vadd.f32 %v2210_v46, %v1044_v53  ;;  %v1450_v53 = vpop.permute.xlu0 %1449 }
 0x282   :  { %v1137_v23 = vpop.f32.mrf.mxu0  ;;  %v2221_v50 = vpop.f32.mrf.mxu1 }
 0x283   :  { %v1230_v58 = vadd.f32 %v2221_v50, %v1131_v52  ;;  %v1138_v1 = vadd.f32 %v1137_v23, %v1038_v57  ;;  %v1455_v57 = vrot.slane %v1450_v53, %v84_v32 }
 0x284   :  { %v1221_v54 = vpop.f32.mrf.mxu1  ;;  %v2235_v55 = vpop.f32.mrf.mxu0 }
 0x285   :  { %v1222_v62 = vadd.f32 %v1221_v54, %v1124_v56  ;;  %v1335_v2 = vadd.f32 %v2235_v55, %v1230_v58 }
 0x286   :  { %v1328_v59 = vpop.f32.mrf.mxu0 }
 0x287   :  { %v2224_v60 = vpop.f32.mrf.mxu1  ;;  %v1329_v5 = vadd.f32 %v1328_v59, %v1222_v62 }
 0x288   :  { %v2238_v0 = vpop.f32.mrf.mxu0  ;;  %v1246_v3 = vadd.f32 %v2224_v60, %v1145_v61 }
 0x289   :  { %v1237_v63 = vpop.f32.mrf.mxu1 }
 0x28a   :  { %v1238_v6 = vadd.f32 %v1237_v63, %v1138_v1  ;;  %v1340_v8 = vpop.f32.mrf.mxu0  ;;  %v1347_v10 = vadd.f32 %v2238_v0, %v1246_v3 }
 0x28b   :  { %v2249_v4 = vpop.f32.mrf.mxu1 }
 0x28c   :  { %v1428_v7 = vadd.f32 %v2249_v4, %v1335_v2  ;;  %v1341_v14 = vadd.f32 %v1340_v8, %v1238_v6 }
 0x28d   :  { %v1421_v9 = vpop.f32.mrf.mxu1 }
 0x28e   :  { %2347 = vtanh.f32 %v1428_v7  ;;  %v1422_v11 = vadd.f32 %v1421_v9, %v1329_v5 }
 0x28f   :  { %v2252_v12 = vpop.f32.mrf.mxu1 }
 0x290   :  { %2349 = vtanh.f32 %v1422_v11  ;;  %v1440_v15 = vadd.f32 %v2252_v12, %v1347_v10 }
 0x291   :  { %v1433_v16 = vpop.f32.mrf.mxu1 }
 0x292   :  { %2351 = vtanh.f32 %v1440_v15  ;;  %v1434_v17 = vadd.f32 %v1433_v16, %v1341_v14 }
 0x294   :  { %2353 = vtanh.f32 %v1434_v17 }
 0x29b   :  { %v2348_v24 = vpop.eup %2347 }
 0x29c   :  { %v2731_v25 = vand.u32 4294901760, %v2348_v24 }
 0x29d   :  { %v2350_v26 = vpop.eup %2349 }
 0x29e   :  { %v2734_v29 = vand.u32 4294901760, %v2350_v26  ;;  %v1578_v30 = vsub.f32 %v2348_v24, %v2731_v25 }
 0x29f   :  { %v2352_v48 = vpop.eup %2351 }
 0x2a0   :  { %v2736_v19 = vand.u32 4294901760, %v2352_v48  ;;  %v1585_v36 = vsub.f32 %v2350_v26, %v2734_v29  ;;  %v1579_v39 = vand.u32 4294901760, %v1578_v30 }
 0x2a1   :  { %v2354_v31 = vpop.eup %2353 }
 0x2a2   :  { %2254 = vmatpush3.msra.mxu0 %v2736_v19  ;;  %v2743_v34 = vand.u32 4294901760, %v2354_v31  ;;  %v1564_v35 = vsub.f32 %v2352_v48, %v2736_v19  ;;  %v1586_v43 = vand.u32 4294901760, %v1585_v36  ;;  %v1580_v46 = vsub.f32 %v1578_v30, %v1579_v39 }
 0x2a3   :  { %2255 = vmatprep.subr.mxu0 %v2379_v49 }
 0x2a4   :  { %2256 = vmatpush3.msra.mxu0 %v2743_v34  ;;  %v1565_v37 = vand.u32 4294901760, %v1564_v35  ;;  %v1571_v38 = vsub.f32 %v2354_v31, %v2743_v34  ;;  %v1587_v21 = vsub.f32 %v1585_v36, %v1586_v43  ;;  %v1581_v23 = vand.u32 4294901760, %v1580_v46 }
 0x2a5   :  { %2257 = vmatprep.subr.mxu0 %v2379_v49 }
 0x2a6   :  { %2258 = vmatpush3.msra.mxu0 %v2731_v25  ;;  %v1566_v41 = vsub.f32 %v1564_v35, %v1565_v37  ;;  %v1572_v42 = vand.u32 4294901760, %v1571_v38  ;;  %v1588_v50 = vand.u32 4294901760, %v1587_v21 }
 0x2a7   :  { %2259 = vmatprep.subr.mxu0 %v2379_v49 }
 0x2a8   :  { %2260 = vmatpush3.msra.mxu0 %v2734_v29  ;;  %v1567_v44 = vand.u32 4294901760, %v1566_v41  ;;  %v1573_v45 = vsub.f32 %v1571_v38, %v1572_v42 }
 0x2a9   :  { %2262 = vmatmul.mubr.f32.vlgmr.msra.gmra.mxu0 %v1532_v40  ;;  %2275 = vmatprep.subr.mxu0 %v2379_v49 }
 0x2aa   :  { %2265 = vmatpush3.msra.mxu1 %v1567_v44  ;;  %2276 = vmatpush3.msra.mxu0 %v1564_v35  ;;  %v1574_v47 = vand.u32 4294901760, %v1573_v45 }
 0x2ab   :  { %2266 = vmatprep.subr.mxu1 %v2379_v49  ;;  %2277 = vmatprep.subr.mxu0 %v2379_v49 }
 0x2ac   :  { %2267 = vmatpush3.msra.mxu1 %v1574_v47  ;;  %2278 = vmatpush3.msra.mxu0 %v1571_v38 }
 0x2ad   :  { %2268 = vmatprep.subr.mxu1 %v2379_v49  ;;  %2279 = vmatprep.subr.mxu0 %v2379_v49 }
 0x2ae   :  { %2269 = vmatpush3.msra.mxu1 %v1581_v23  ;;  %2280 = vmatpush3.msra.mxu0 %v1578_v30 }
 0x2af   :  { %2270 = vmatprep.subr.mxu1 %v2379_v49  ;;  %2281 = vmatprep.subr.mxu0 %v2379_v49 }
 0x2b0   :  { %2271 = vmatpush3.msra.mxu1 %v1588_v50  ;;  %2282 = vmatpush3.msra.mxu0 %v1585_v36 }
 0x2b1   :  { %2273 = vmatmul.mubr.f32.vlgmr.msra.gmra.mxu1 %v2726_v20  ;;  %2283 = vmatprep.mubr.msk.f32.mxu0 %vm2380_vm1, %v2379_v49 }
 0x2b2   :  { %2286 = vmatprep.subr.mxu1 %v2379_v49  ;;  %2297 = vmatprep.subr.mxu0 %v2379_v49 }
 0x2b3   :  { %2284 = vmatmul.mubr.f32.vlgmr.msra.gmra.mxu0 %v2729_v22  ;;  %2287 = vmatpush3.msra.mxu1 %v2736_v19 }
 0x2b4   :  { %2298 = vmatpush3.msra.mxu0 %v1565_v37  ;;  %2288 = vmatprep.subr.mxu1 %v2379_v49 }
 0x2b5   :  { %2299 = vmatprep.subr.mxu0 %v2379_v49  ;;  %2289 = vmatpush3.msra.mxu1 %v2743_v34 }
 0x2b6   :  { %2300 = vmatpush3.msra.mxu0 %v1572_v42  ;;  %2290 = vmatprep.subr.mxu1 %v2379_v49 }
 0x2b7   :  { %2301 = vmatprep.subr.mxu0 %v2379_v49  ;;  %2291 = vmatpush3.msra.mxu1 %v2731_v25 }
 0x2b8   :  { %2302 = vmatpush3.msra.mxu0 %v1579_v39  ;;  %2292 = vmatprep.subr.mxu1 %v2379_v49 }
 0x2b9   :  { %2303 = vmatprep.subr.mxu0 %v2379_v49  ;;  %2293 = vmatpush3.msra.mxu1 %v2734_v29 }
 0x2ba   :  { %2294 = vmatprep.mubr.msk.f32.mxu1 %vm2380_vm1, %v2379_v49  ;;  %2304 = vmatpush3.msra.mxu0 %v1586_v43 }
 0x2bb   :  { %2295 = vmatmul.mubr.f32.vlgmr.msra.gmra.mxu1 %v1530_v27  ;;  %2308 = vmatprep.subr.mxu1 %v2379_v49 }
 0x2bc   :  { %2305 = vmatprep.mubr.msk.f32.mxu0 %vm2380_vm1, %v2379_v49  ;;  %2309 = vmatpush3.msra.mxu1 %v2736_v19 }
 0x2bd   :  { %2306 = vmatmul.mubr.f32.vlgmr.msra.gmra.mxu0 %v2726_v20  ;;  %2310 = vmatprep.subr.mxu1 %v2379_v49 }
 0x2be   :  { %2311 = vmatpush3.msra.mxu1 %v2743_v34  ;;  %2316 = vmatprep.mubr.msk.f32.mxu1 %vm2380_vm1, %v2379_v49 }
 0x2bf   :  { %2312 = vmatprep.subr.mxu1 %v2379_v49 }
 0x2c0   :  { %2313 = vmatpush3.msra.mxu1 %v2731_v25 }
 0x2c1   :  { %2314 = vmatprep.subr.mxu1 %v2379_v49 }
 0x2c2   :  { %2315 = vmatpush3.msra.mxu1 %v2734_v29 }
 0x2c3   :  { %2317 = vmatmul.mubr.f32.vlgmr.msra.gmra.mxu1 %v2726_v20 }
 0x369   :  { %v1534_v51 = vpop.f32.mrf.mxu0 }
 0x36a   :  { %v1535_v59 = vadd.f32 %v1534_v51, %v1455_v57 }
 0x36b   :  { %v2263_v52 = vpop.f32.mrf.mxu0 }
 0x371   :  { %v1625_v54 = vpop.f32.mrf.mxu1 }
 0x372   :  { %v1626_v60 = vadd.f32 %v1625_v54, %v1535_v59 }
 0x373   :  { %v2274_v55 = vpop.f32.mrf.mxu1  ;;  %v1705_v56 = vpop.f32.mrf.mxu0 }
 0x374   :  { %v1706_v62 = vadd.f32 %v1705_v56, %v1626_v60 }
 0x375   :  { %v2285_v58 = vpop.f32.mrf.mxu0 }
 0x37b   :  { %v1782_v61 = vpop.f32.mrf.mxu1 }
 0x37c   :  { %v1783_v0 = vadd.f32 %v1782_v61, %v1706_v62 }
 0x37d   :  { %v2296_v63 = vpop.f32.mrf.mxu1  ;;  %v1865_v49 = vpop.f32.mrf.mxu0 }
 0x37e   :  { %v1866_v2 = vadd.f32 %v1865_v49, %v1783_v0 }
 0x37f   :  { %v2307_v1 = vpop.f32.mrf.mxu0 }
 0x383   :  { %v1940_v3 = vpop.f32.mrf.mxu1 }
 0x384   :  { %v1941_v4 = vadd.f32 %v1940_v3, %v1866_v2 }
 0x385   :  { %v2318_v5 = vpop.f32.mrf.mxu1 }
 0x386   :  { %1944 = vst [vmem:[#allocation3] sm:$0x1] %v1941_v4 }
 0x387   :  { %2366 = shalt.err (!%p2363_p4)
}
 0x388   :  { %1954 = dma.vmem_to_hbm [thread:$0]  %s1952_s11, 16, %s2809_s9, [#allocation4]  }
 0x389   :  { %2375 = dma.done.wait [#allocation4], 16  }
 0x38a   :  { %2376 = vsyncadd [#allocation4], 4294967280 }
 0x38b   :  { %1958 = vsyncpa [#allocation4], 1 }

</bundles_post_ra>
